<compile_context>
chip_gen: v6e
topology: v6e:2x2x1
jax: 0.10.0
libtpu: 0.0.40
codegen_flags: <defaults>
</compile_context>

<pallas_src>
import functools

import numpy as np

import jax
import jax.numpy as jnp
from jax.experimental import pallas as pl
from jax.experimental.pallas import tpu as pltpu


def _gumbel_noise_kernel(x_ref, u_ref, hard_ref, *, eps):
    """hard = (x + logistic_noise >= 0); compute in f32, store narrow."""
    x = x_ref[...].astype(jnp.float32)
    u = u_ref[...].astype(jnp.float32)
    # logit(u) with the reference's eps guards; distributionally identical to
    # g1 - g2 of two independent Gumbel(0,1) samples.
    noise = jnp.log((u + eps) / ((1.0 - u) + eps))
    # sigmoid((x + noise)/temp) >= 0.5  <=>  x + noise >= 0   (temp > 0)
    hard = ((x + noise) >= 0.0).astype(jnp.float32)
    hard_ref[...] = hard.astype(hard_ref.dtype)


def _threshold_kernel(x_ref, hard_ref):
    """hard = (x >= 0); covers eval and the training-without-noise path."""
    hard = (x_ref[...] >= 0.0).astype(jnp.float32)
    hard_ref[...] = hard.astype(hard_ref.dtype)


def _lane_dense_2d(x):
    """Reshape (free for elementwise ops) so the last dim is a big multiple of 128."""
    e = x.size
    if e % 128 == 0:
        lanes = next(c for c in (1024, 512, 256, 128) if e % c == 0)
        return x.reshape(e // lanes, lanes)
    # TODO(synk): element counts not divisible by 128 fall back to the natural
    # trailing dim and pay masked partial stores.
    lanes = x.shape[-1]
    return x.reshape(e // lanes, lanes)


@functools.partial(jax.jit, static_argnames=("eps", "use_noise", "out_dtype"))
def _gumbel_hard(x, key, *, eps, use_noise, out_dtype):
    """Runs the Pallas kernel; returns the 0/1 mask with x's original shape."""
    x2 = _lane_dense_2d(x)
    R, L = x2.shape

    # ~2 MiB (f32) input blocks: with up to 3 double-buffered streams this stays
    # well inside every generation's default scoped VMEM (16 MiB on v5e,
    # 32 MiB on v6e/v7x).
    target_block_bytes = 2 * 1024 * 1024
    tr = max(8, (target_block_bytes // (L * 4)) // 8 * 8)
    if R >= 16:
        # Guarantee at least 2 grid steps so the "parallel" axis can shard
        # across v7x's two TensorCores.
        tr = min(tr, pl.cdiv(pl.cdiv(R, 2), 8) * 8)
    TR = min(tr, R)
    grid = (pl.cdiv(R, TR),)

    spec = pl.BlockSpec((TR, L), lambda i: (i, 0))
    out_bytes = R * L * np.dtype(out_dtype).itemsize
    in_bytes = R * L * np.dtype(x2.dtype).itemsize

    if use_noise:
        u2 = jax.random.uniform(key, (R, L), dtype=jnp.float32)
        kernel = functools.partial(_gumbel_noise_kernel, eps=float(eps))
        operands = (x2, u2)
        in_specs = [spec, spec]
        cost = pl.CostEstimate(
            flops=6 * R * L,
            transcendentals=2 * R * L,
            bytes_accessed=in_bytes + R * L * 4 + out_bytes,
        )
    else:
        kernel = _threshold_kernel
        operands = (x2,)
        in_specs = [spec]
        cost = pl.CostEstimate(
            flops=R * L,
            transcendentals=0,
            bytes_accessed=in_bytes + out_bytes,
        )

    hard2 = pl.pallas_call(
        kernel,
        out_shape=jax.ShapeDtypeStruct((R, L), out_dtype),
        grid=grid,
        in_specs=in_specs,
        out_specs=spec,
        compiler_params=pltpu.CompilerParams(
            dimension_semantics=("parallel",)),
        cost_estimate=cost,
    )(*operands)

    return hard2.reshape(x.shape)


class Mask:
    """JAX equivalent of the PyTorch Mask helper (host-side glue)."""

    def __init__(self, hard):
        self.hard = hard
        if hard is None:
            self.n_keep = 0
        else:
            # host sync; mirrors torch.sum(hard).item() (sum in int32, the 0/1
            # values are exact in the narrow storage dtype)
            self.n_keep = int(jnp.sum(hard.astype(jnp.int32)))
        if self.n_keep == 0:
            self.nonzero_hard = None
        else:
            # TODO(synk): torch.nonzero has data-dependent output shape; no
            # fixed-shape Pallas equivalent, computed with eager jnp.nonzero.
            self.nonzero_hard = jnp.nonzero(hard[0][0])


def gumbel_forward(x, key=None, gumbel_temp=1.0, gumbel_noise=True,
                   training=True, eps=1e-8, out_dtype=jnp.bfloat16,
                   debug_checks=False):
    """Forward pass of the Gumbel module. x is NCHW float."""
    # For any temp > 0, sigmoid is monotone, so the hard forward value does
    # not depend on gumbel_temp.
    assert gumbel_temp > 0.0
    use_noise = bool(training and gumbel_noise)
    if use_noise and key is None:
        key = jax.random.PRNGKey(0)

    hard = _gumbel_hard(x, key if use_noise else None,
                        eps=float(eps), use_noise=use_noise,
                        out_dtype=out_dtype)

    if debug_checks:
        # optional device->host sync; mirrors the PyTorch NaN assert
        assert not bool(jnp.any(jnp.isnan(hard.astype(jnp.float32))))

    return Mask(hard)


if __name__ == "__main__":
    key = jax.random.PRNGKey(0)
    kx, knoise = jax.random.split(key)

    # small NCHW conv-activation shapes
    N, C, H, W = 2, 4, 16, 16
    x = jax.random.normal(kx, (N, C, H, W), dtype=jnp.float32)

    # training path with Gumbel (logistic) noise
    mask_train = gumbel_forward(x, knoise, gumbel_temp=1.0,
                                gumbel_noise=True, training=True)
    jax.block_until_ready(mask_train.hard)
    ht = mask_train.hard.astype(jnp.float32)
    assert mask_train.hard.shape == (N, C, H, W)
    assert bool(jnp.all((ht == 0.0) | (ht == 1.0)))
    assert mask_train.n_keep == int(jnp.sum(ht))

    # training path without noise: forward value is exactly (x >= 0)
    mask_nonoise = gumbel_forward(x, gumbel_noise=False, training=True)
    jax.block_until_ready(mask_nonoise.hard)
    hn = mask_nonoise.hard.astype(jnp.float32)
    assert bool(jnp.all(hn == (x >= 0).astype(jnp.float32)))

    # eval path: hard = (x >= 0).float(), bit-exact
    mask_eval = gumbel_forward(x, training=False)
    jax.block_until_ready(mask_eval.hard)
    he = mask_eval.hard.astype(jnp.float32)
    assert bool(jnp.all(he == (x >= 0).astype(jnp.float32)))

    print("KERNEL_OK")
</pallas_src>

<mosaic_0001>
module attributes {stable_mosaic.version = 11 : i64} {
  func.func @_gumbel_noise_kernel(%arg0: i32, %arg1: memref<2x1024xf32, #tpu.memory_space<vmem>>, %arg2: memref<2x1024xf32, #tpu.memory_space<vmem>>, %arg3: memref<2x1024xbf16, #tpu.memory_space<vmem>>) attributes {dimension_semantics = [#tpu.dimension_semantics<parallel>], iteration_bounds = array<i64: 1>, scalar_prefetch = 0 : i64, scratch_operands = 0 : i64, tpu.core_type = #tpu.core_type<tc>, window_params = [{transform_indices = @transform_0, window_bounds = array<i64: 2, 1024>}, {transform_indices = @transform_1, window_bounds = array<i64: 2, 1024>}, {transform_indices = @transform_2, window_bounds = array<i64: 2, 1024>}]} {
    %c0 = arith.constant 0 : index
    %c0_0 = arith.constant 0 : index
    %0 = vector.load %arg1[%c0, %c0_0] : memref<2x1024xf32, #tpu.memory_space<vmem>>, vector<2x1024xf32>
    %c0_1 = arith.constant 0 : index
    %c0_2 = arith.constant 0 : index
    %1 = vector.load %arg2[%c0_1, %c0_2] : memref<2x1024xf32, #tpu.memory_space<vmem>>, vector<2x1024xf32>
    %cst = arith.constant 9.99999993E-9 : f32
    %2 = vector.broadcast %cst : f32 to vector<2x1024xf32>
    %3 = arith.addf %1, %2 : vector<2x1024xf32>
    %cst_3 = arith.constant 1.000000e+00 : f32
    %4 = vector.broadcast %cst_3 : f32 to vector<2x1024xf32>
    %5 = arith.subf %4, %1 : vector<2x1024xf32>
    %cst_4 = arith.constant 9.99999993E-9 : f32
    %6 = vector.broadcast %cst_4 : f32 to vector<2x1024xf32>
    %7 = arith.addf %5, %6 : vector<2x1024xf32>
    %8 = arith.divf %3, %7 : vector<2x1024xf32>
    %9 = math.log %8 : vector<2x1024xf32>
    %10 = arith.addf %0, %9 : vector<2x1024xf32>
    %cst_5 = arith.constant 0.000000e+00 : f32
    %11 = vector.broadcast %cst_5 : f32 to vector<2x1024xf32>
    %12 = arith.cmpf oge, %10, %11 : vector<2x1024xf32>
    %13 = arith.extui %12 : vector<2x1024xi1> to vector<2x1024xi32>
    %14 = arith.sitofp %13 : vector<2x1024xi32> to vector<2x1024xf32>
    %15 = arith.truncf %14 : vector<2x1024xf32> to vector<2x1024xbf16>
    %c0_6 = arith.constant 0 : index
    %c0_7 = arith.constant 0 : index
    %16 = vector.load %arg3[%c0_6, %c0_7] : memref<2x1024xbf16, #tpu.memory_space<vmem>>, vector<2x1024xbf16>
    tpu.vector_store %arg3[%c0_6, %c0_7], %15 {strides = array<i32>} : memref<2x1024xbf16, #tpu.memory_space<vmem>>, vector<2x1024xbf16>,
    return
  }
  func.func @transform_0(%arg0: i32) -> (i32, i32) {
    %c0_i32 = arith.constant 0 : i32
    %c0_i32_0 = arith.constant 0 : i32
    return %arg0, %c0_i32 : i32, i32
  }
  func.func @transform_1(%arg0: i32) -> (i32, i32) {
    %c0_i32 = arith.constant 0 : i32
    %c0_i32_0 = arith.constant 0 : i32
    return %arg0, %c0_i32 : i32, i32
  }
  func.func @transform_2(%arg0: i32) -> (i32, i32) {
    %c0_i32 = arith.constant 0 : i32
    %c0_i32_0 = arith.constant 0 : i32
    return %arg0, %c0_i32 : i32, i32
  }
}

</mosaic_0001>

<bundles_post_ra>
// kernel: _gumbel_hard.1
= control target key start
LH: loop header
LB: loop body
LE: loop exit
PB: predicated region body
PF: predicated region fallthrough
CT: control target
= control target key end

     0   :  { %v169_v12 = vmov 1983009808   ;;  %v43_v14 = vlaneseq  ;;  %v170_v22 = vmov 1966171168   ;;  %v171_v29 = vmov 0.0   ;;  %s202_s1 = inlined_call_operand.vmem [shape: f32[2,1024], index: 1, kind: input, shape index: {}]   ;;  %s203_s0 = inlined_call_operand.vmem [shape: f32[2,1024], index: 0, kind: input, shape index: {}]   ;;  %s204_s2 = inlined_call_operand.vmem [shape: bf16[2,1024], index: 2, kind: output, shape index: {}]  }
   0x1   :  { %v13_v0 = vld [vmem:[%s202_s1] sm:$0xff]  ;;  %v14_v1 = vld [vmem:[%s202_s1 + $0x8] sm:$0xff]  ;;  %v41_v13 = vunpack.c.l.s4 %v169_v12  ;;  %v102_v23 = vunpack.c.l.s4 %v170_v22 }
   0x2   :  { %v17_v2 = vsub.f32 1.0, %v13_v0  ;;  %v18_v3 = vsub.f32 1.0, %v14_v1  ;;  %v15_v6 = vadd.f32 1e-08, %v13_v0  ;;  %v16_v7 = vadd.f32 1e-08, %v14_v1 }
   0x3   :  { %v42_v15 = vunpack.c.0.s8 %v41_v13  ;;  %v44_v16 = vshrl.u32 %v43_v14, 7  ;;  %v11_v18 = vld [vmem:[%s203_s0] sm:$0xff]  ;;  %v12_v20 = vld [vmem:[%s203_s0 + $0x8] sm:$0xff]  ;;  %v103_v28 = vunpack.c.0.s8 %v102_v23 }
   0x4   :  { %v19_v4 = vadd.f32 1e-08, %v17_v2  ;;  %v20_v5 = vadd.f32 1e-08, %v18_v3 }
   0x5   :  { %v45_v26 = vsub.s32 %v42_v15, %v44_v16  ;;  %v106_v38 = vsub.s32 %v103_v28, %v44_v16 }
   0x6   :  { %161 = vrcp.f32 %v19_v4 }
   0x7   :  { %163 = vrcp.f32 %v20_v5 }
  0x13   :  { %v162_v8 = vpop.eup %161 }
  0x14   :  { %v164_v9 = vpop.eup %163  ;;  %v22_v10 = vmul.f32 %v162_v8, %v15_v6 }
  0x15   :  { %v24_v11 = vmul.f32 %v164_v9, %v16_v7 }
  0x16   :  { %165 = vlog2.f32 %v22_v10 }
  0x17   :  { %167 = vlog2.f32 %v24_v11 }
  0x23   :  { %v166_v17 = vpop.eup %165 }
  0x24   :  { %v168_v19 = vpop.eup %167  ;;  %v26_v21 = vmul.f32 0.6931472, %v166_v17 }
  0x25   :  { %v28_v24 = vmul.f32 0.6931472, %v168_v19 }
  0x26   :  { %v29_v25 = vadd.f32 %v26_v21, %v11_v18 }
  0x27   :  { %v30_v27 = vadd.f32 %v28_v24, %v12_v20 }
  0x28   :  { %vm31_vm0 = vcmp.ge.f32.partialorder %v29_v25, 0.0 }
  0x29   :  { %vm32_vm1 = vcmp.ge.f32.partialorder %v30_v27, 0.0  ;;  %v152_v30 = vsel %vm31_vm0, 1.0, %v171_v29 }
  0x2a   :  { %v153_v31 = vsel %vm32_vm1, 1.0, %v171_v29  ;;  %v39_v32 = vcombine.high %v152_v30, %v152_v30  ;;  %v46_v33 = vrot.slane %v152_v30, %v45_v26 }
  0x2b   :  { %v56_v34 = vcombine.high %v153_v31, %v153_v31  ;;  %v63_v35 = vrot.slane %v153_v31, %v45_v26 }
  0x2c   :  { %v53_v36 = vrot.slane %v39_v32, %v45_v26  ;;  %v54_v37 = vcombine.high %v46_v33, %v46_v33 }
  0x2d   :  { %v70_v39 = vrot.slane %v56_v34, %v45_v26  ;;  %v71_v40 = vcombine.high %v63_v35, %v63_v35 }
  0x2e   :  { %v55_v41 = vcombine.high %v53_v36, %v53_v36  ;;  %v154_v42 = vpack.c.bf16 %v54_v37, %v46_v33 }
  0x2f   :  { %v72_v43 = vcombine.high %v70_v39, %v70_v39  ;;  %v156_v44 = vpack.c.bf16 %v71_v40, %v63_v35 }
  0x30   :  { %v155_v45 = vpack.c.bf16 %v55_v41, %v53_v36  ;;  %v107_v46 = vrot.slane %v154_v42, %v106_v38 }
  0x31   :  { %v157_v47 = vpack.c.bf16 %v72_v43, %v70_v39  ;;  %v121_v48 = vrot.slane %v156_v44, %v106_v38 }
  0x32   :  { %v114_v49 = vrot.slane %v155_v45, %v106_v38 }
  0x33   :  { %v128_v50 = vrot.slane %v157_v47, %v106_v38 }
  0x34   :  { %v129_v51 = vcombine.low %v107_v46, %v114_v49 }
  0x35   :  { %v130_v52 = vcombine.low %v121_v48, %v128_v50 }
  0x36   :  { %v137_v53 = vrot.slane %v129_v51, %v106_v38 }
  0x37   :  { %v144_v54 = vrot.slane %v130_v52, %v106_v38 }
  0x39   :  { %v145_v55 = vcombine.low %v137_v53, %v144_v54 }
  0x3b   :  { %147 = vst [vmem:[%s204_s2] sm:$0xff] %v145_v55 }

</bundles_post_ra>
